<compile_context>
chip_gen: v5e
topology: v5e:2x2
jax: 0.10.0
libtpu: 0.0.40
codegen_flags: <defaults>
</compile_context>

<pallas_src>
import functools
import math

import jax
import jax.numpy as jnp
from jax.experimental import pallas as pl
from jax.experimental.pallas import tpu as pltpu

FEAT = 128  # padded lane width for every feature dim (obs, hidden, act)


def _round_up(x, m):
    return ((x + m - 1) // m) * m


def actor_mlp_kernel(x_ref, w_ref, b_ref, out_ref, *, use_bf16_matmul: bool = False):
    """Fused 3-layer MLP on one [tile_b, FEAT] batch tile.

    x_ref  : [tile_b, FEAT]   f32   (obs zero-padded on the lane axis)
    w_ref  : [3, FEAT, FEAT]  f32   (layer l weights at w_ref[l], zero-padded)
    b_ref  : [8, FEAT]        f32   (row l = layer l bias, zero-padded)
    out_ref: [tile_b, FEAT]   f32   (lane-dense logits; cols >= act_size are zero)
    """

    def linear(a, l):
        w = w_ref[l]
        if use_bf16_matmul:
            # bf16 MXU operands, f32 accumulation; bias/tanh stay f32 (v5e-safe).
            a = a.astype(jnp.bfloat16)
            w = w.astype(jnp.bfloat16)
        acc = jnp.dot(a, w, preferred_element_type=jnp.float32)
        return acc + b_ref[l : l + 1, :]

    x = x_ref[...]
    h = jnp.tanh(linear(x, 0))
    h = jnp.tanh(linear(h, 1))
    out_ref[...] = linear(h, 2).astype(out_ref.dtype)


def pack_actor_params(params, feat=FEAT):
    """Pack ((w1,b1),(w2,b2),(w3,b3)) into one weight slab and one bias slab.

    Weights are stored [in, out] (transpose of torch's [out, in]); zero padding of
    the unused rows/cols keeps the padded lanes exactly zero through tanh(0)=0, so
    the unpadded logits are bit-identical to the unpadded computation.
    """
    (w1, b1), (w2, b2), (w3, b3) = params

    def pad_w(w):
        out = jnp.zeros((feat, feat), jnp.float32)
        return out.at[: w.shape[0], : w.shape[1]].set(w)

    w_packed = jnp.stack([pad_w(w1), pad_w(w2), pad_w(w3)])  # [3, feat, feat]
    b_packed = jnp.zeros((8, feat), jnp.float32)             # 8 rows: sublane aligned
    for i, b in enumerate((b1, b2, b3)):
        b_packed = b_packed.at[i, : b.shape[-1]].set(b.reshape(-1))
    return w_packed, b_packed


def actor_forward(obs, packed_params, act_size, *, tile_b=256, use_bf16_matmul=False):
    """Runs the fused Pallas kernel. obs: [B, obs_size] f32 -> logits [B, act_size]."""
    w_packed, b_packed = packed_params
    batch, obs_size = obs.shape
    feat = w_packed.shape[-1]

    # Batch tile: at least the (8-rounded) batch, at most tile_b; pad rows with zeros.
    tile_b = min(tile_b, _round_up(batch, 8))
    b_pad = _round_up(batch, tile_b)
    x = jnp.zeros((b_pad, feat), jnp.float32).at[:batch, :obs_size].set(obs)

    grid = (b_pad // tile_b,)
    kernel = functools.partial(actor_mlp_kernel, use_bf16_matmul=use_bf16_matmul)

    out = pl.pallas_call(
        kernel,
        out_shape=jax.ShapeDtypeStruct((b_pad, feat), jnp.float32),
        grid=grid,
        in_specs=[
            # obs tile: marches along the batch grid axis.
            pl.BlockSpec((tile_b, feat), lambda i: (i, 0)),
            # packed weights / biases: VMEM-resident across all grid steps.
            pl.BlockSpec((3, feat, feat), lambda i: (0, 0, 0)),
            pl.BlockSpec((8, feat), lambda i: (0, 0)),
        ],
        out_specs=pl.BlockSpec((tile_b, feat), lambda i: (i, 0)),
        compiler_params=pltpu.CompilerParams(
            dimension_semantics=("parallel",),  # shard batch tiles across TCs (v7x)
        ),
    )(x, w_packed, b_packed)

    return out[:batch, :act_size]


def init_linear(key, fan_in, fan_out):
    """PyTorch nn.Linear default init: U(-1/sqrt(fan_in), 1/sqrt(fan_in))."""
    kw, kb = jax.random.split(key)
    bound = 1.0 / math.sqrt(fan_in)
    # stored as [in, out] (transposed vs. torch's [out, in])
    w = jax.random.uniform(kw, (fan_in, fan_out), jnp.float32, -bound, bound)
    b = jax.random.uniform(kb, (1, fan_out), jnp.float32, -bound, bound)
    return w, b


def init_actor_params(key, obs_size, hidden_sizes, act_size):
    sizes = [obs_size] + list(hidden_sizes) + [act_size]
    keys = jax.random.split(key, len(sizes) - 1)
    return [init_linear(k, fi, fo) for k, fi, fo in zip(keys, sizes[:-1], sizes[1:])]


def actor_forward_ref(obs, params):
    """Pure-JAX reference of the same forward pass (for verification)."""
    (w1, b1), (w2, b2), (w3, b3) = params
    h = jnp.tanh(obs @ w1 + b1)
    h = jnp.tanh(h @ w2 + b2)
    return h @ w3 + b3


# TODO(synk): get_policy/get_action (Categorical sampling + .item()) are host-side
# control flow, not kernel work; apply jax.random.categorical to these logits outside.

if __name__ == "__main__":
    obs_size, hidden_sizes, act_size = 16, [32, 32], 8

    key = jax.random.PRNGKey(0)
    k_obs, k_obs2, k_params = jax.random.split(key, 3)
    params = init_actor_params(k_params, obs_size, hidden_sizes, act_size)
    packed = pack_actor_params(params)

    # Small batch (single grid step).
    batch = 4
    obs = jax.random.normal(k_obs, (batch, obs_size), dtype=jnp.float32)
    logits = actor_forward(obs, packed, act_size)
    jax.block_until_ready(logits)
    ref = actor_forward_ref(obs, params)
    assert logits.shape == (batch, act_size)
    assert jnp.allclose(logits, ref, atol=1e-5, rtol=1e-5), "mismatch vs. JAX reference"

    # Larger, non-multiple batch to exercise the multi-tile grid + row padding path.
    batch2 = 300
    obs2 = jax.random.normal(k_obs2, (batch2, obs_size), dtype=jnp.float32)
    logits2 = actor_forward(obs2, packed, act_size, tile_b=128)
    jax.block_until_ready(logits2)
    ref2 = actor_forward_ref(obs2, params)
    assert logits2.shape == (batch2, act_size)
    assert jnp.allclose(logits2, ref2, atol=1e-5, rtol=1e-5), "mismatch (tiled path)"

    print("KERNEL_OK")
</pallas_src>

<mosaic_0001>
module attributes {stable_mosaic.version = 11 : i64} {
  func.func @actor_mlp_kernel(%arg0: i32, %arg1: memref<8x128xf32, #tpu.memory_space<vmem>>, %arg2: memref<3x128x128xf32, #tpu.memory_space<vmem>>, %arg3: memref<8x128xf32, #tpu.memory_space<vmem>>, %arg4: memref<8x128xf32, #tpu.memory_space<vmem>>) attributes {dimension_semantics = [#tpu.dimension_semantics<parallel>], iteration_bounds = array<i64: 1>, scalar_prefetch = 0 : i64, scratch_operands = 0 : i64, tpu.core_type = #tpu.core_type<tc>, window_params = [{transform_indices = @transform_0, window_bounds = array<i64: 8, 128>}, {pipeline_mode = #tpu.pipeline_mode<synchronous>, transform_indices = @transform_1, window_bounds = array<i64: 3, 128, 128>}, {pipeline_mode = #tpu.pipeline_mode<synchronous>, transform_indices = @transform_2, window_bounds = array<i64: 8, 128>}, {transform_indices = @transform_3, window_bounds = array<i64: 8, 128>}]} {
    %c0 = arith.constant 0 : index
    %c0_0 = arith.constant 0 : index
    %0 = vector.load %arg1[%c0, %c0_0] : memref<8x128xf32, #tpu.memory_space<vmem>>, vector<8x128xf32>
    %c0_1 = arith.constant 0 : index
    %c0_2 = arith.constant 0 : index
    %c0_3 = arith.constant 0 : index
    %1 = vector.load %arg2[%c0_1, %c0_2, %c0_3] : memref<3x128x128xf32, #tpu.memory_space<vmem>>, vector<1x128x128xf32>
    %2 = vector.shape_cast %1 : vector<1x128x128xf32> to vector<128x128xf32>
    %cst = arith.constant dense<0.000000e+00> : vector<8x128xf32>
    %3 = tpu.matmul %0, %2, %cst {dimension_numbers = #tpu.dot_dimension_numbers<[1], [0], [0], [1], [0, 0, 1, 1], [], []>} : vector<8x128xf32>, vector<128x128xf32>, vector<8x128xf32> -> vector<8x128xf32>
    %c0_4 = arith.constant 0 : index
    %c0_5 = arith.constant 0 : index
    %4 = vector.load %arg3[%c0_4, %c0_5] : memref<8x128xf32, #tpu.memory_space<vmem>>, vector<1x128xf32>
    %5 = vector.broadcast %4 : vector<1x128xf32> to vector<8x128xf32>
    %6 = arith.addf %3, %5 : vector<8x128xf32>
    %7 = math.tanh %6 : vector<8x128xf32>
    %c1 = arith.constant 1 : index
    %c0_6 = arith.constant 0 : index
    %c0_7 = arith.constant 0 : index
    %8 = vector.load %arg2[%c1, %c0_6, %c0_7] : memref<3x128x128xf32, #tpu.memory_space<vmem>>, vector<1x128x128xf32>
    %9 = vector.shape_cast %8 : vector<1x128x128xf32> to vector<128x128xf32>
    %cst_8 = arith.constant dense<0.000000e+00> : vector<8x128xf32>
    %10 = tpu.matmul %7, %9, %cst_8 {dimension_numbers = #tpu.dot_dimension_numbers<[1], [0], [0], [1], [0, 0, 1, 1], [], []>} : vector<8x128xf32>, vector<128x128xf32>, vector<8x128xf32> -> vector<8x128xf32>
    %c1_9 = arith.constant 1 : index
    %c0_10 = arith.constant 0 : index
    %11 = vector.load %arg3[%c1_9, %c0_10] : memref<8x128xf32, #tpu.memory_space<vmem>>, vector<1x128xf32>
    %12 = vector.broadcast %11 : vector<1x128xf32> to vector<8x128xf32>
    %13 = arith.addf %10, %12 : vector<8x128xf32>
    %14 = math.tanh %13 : vector<8x128xf32>
    %c2 = arith.constant 2 : index
    %c0_11 = arith.constant 0 : index
    %c0_12 = arith.constant 0 : index
    %15 = vector.load %arg2[%c2, %c0_11, %c0_12] : memref<3x128x128xf32, #tpu.memory_space<vmem>>, vector<1x128x128xf32>
    %16 = vector.shape_cast %15 : vector<1x128x128xf32> to vector<128x128xf32>
    %cst_13 = arith.constant dense<0.000000e+00> : vector<8x128xf32>
    %17 = tpu.matmul %14, %16, %cst_13 {dimension_numbers = #tpu.dot_dimension_numbers<[1], [0], [0], [1], [0, 0, 1, 1], [], []>} : vector<8x128xf32>, vector<128x128xf32>, vector<8x128xf32> -> vector<8x128xf32>
    %c2_14 = arith.constant 2 : index
    %c0_15 = arith.constant 0 : index
    %18 = vector.load %arg3[%c2_14, %c0_15] : memref<8x128xf32, #tpu.memory_space<vmem>>, vector<1x128xf32>
    %19 = vector.broadcast %18 : vector<1x128xf32> to vector<8x128xf32>
    %20 = arith.addf %17, %19 : vector<8x128xf32>
    %c0_16 = arith.constant 0 : index
    %c0_17 = arith.constant 0 : index
    %21 = vector.load %arg4[%c0_16, %c0_17] : memref<8x128xf32, #tpu.memory_space<vmem>>, vector<8x128xf32>
    tpu.vector_store %arg4[%c0_16, %c0_17], %20 {strides = array<i32>} : memref<8x128xf32, #tpu.memory_space<vmem>>, vector<8x128xf32>,
    return
  }
  func.func @transform_0(%arg0: i32) -> (i32, i32) {
    %c0_i32 = arith.constant 0 : i32
    %c0_i32_0 = arith.constant 0 : i32
    return %arg0, %c0_i32 : i32, i32
  }
  func.func @transform_1(%arg0: i32) -> (i32, i32, i32) {
    %c0_i32 = arith.constant 0 : i32
    %c0_i32_0 = arith.constant 0 : i32
    %c0_i32_1 = arith.constant 0 : i32
    %c0_i32_2 = arith.constant 0 : i32
    return %c0_i32, %c0_i32_0, %c0_i32_1 : i32, i32, i32
  }
  func.func @transform_2(%arg0: i32) -> (i32, i32) {
    %c0_i32 = arith.constant 0 : i32
    %c0_i32_0 = arith.constant 0 : i32
    %c0_i32_1 = arith.constant 0 : i32
    return %c0_i32, %c0_i32_0 : i32, i32
  }
  func.func @transform_3(%arg0: i32) -> (i32, i32) {
    %c0_i32 = arith.constant 0 : i32
    %c0_i32_0 = arith.constant 0 : i32
    return %arg0, %c0_i32 : i32, i32
  }
}

</mosaic_0001>

<bundles_post_ra>
// kernel: tpu_custom_call.1
= control target key start
LH: loop header
LB: loop body
LE: loop exit
PB: predicated region body
PF: predicated region fallthrough
CT: control target
= control target key end

     0   :  { %8 = vsyncpa [#allocation3], 0  ;;  %s349_s0 = inlined_call_operand.hbm [shape: f32[8,128], index: 0, kind: input, shape index: {}]   ;;  %s350_s1 = inlined_call_operand.hbm [shape: f32[3,128,128], index: 1, kind: input, shape index: {}]   ;;  %s351_s2 = inlined_call_operand.hbm [shape: f32[8,128], index: 2, kind: input, shape index: {}]   ;;  %s352_s3 = inlined_call_operand.hbm [shape: f32[8,128], index: 3, kind: output, shape index: {}]  }
   0x1   :  { %9 = vsyncpa [#allocation6], 0  ;;  %s26_s14 = sshll.u32 %s350_s1, 4  ;;  %s27_s14 = int_to_ptr.hbm [resolvable:$true] %s26_s14 }
   0x2   :  { %10 = vsyncpa [#allocation4], 0  ;;  %s311_s15 = smov [#allocation5]   ;;  %s16_s19 = sshll.u32 %s349_s0, 4  ;;  %s17_s19 = int_to_ptr.hbm [resolvable:$true] %s16_s19 }
   0x3   :  { %s28_s16 = sshll.u32 %s311_s15, 4  ;;  %s312_s20 = smov 128   ;;  %s29_s16 = int_to_ptr.vmem [resolvable:$true] %s28_s16 }
   0x4   :  { %s313_s21 = smov 8   ;;  %s314_s22 = smov [#allocation2]  }
   0x5   :  { %34 = dma.hbm_to_vmem [thread:$0]  %s27_s14, 6144, %s29_s16, [#allocation6], %s312_s20, %s312_s20, %s313_s21  }
   0x6   :  { %s18_s23 = sshll.u32 %s314_s22, 4  ;;  %s40_s26 = sshll.u32 %s351_s2, 4  ;;  %s19_s23 = int_to_ptr.vmem [resolvable:$true] %s18_s23  ;;  %s41_s26 = int_to_ptr.hbm [resolvable:$true] %s40_s26 }
   0x7   :  { %21 = dma.hbm_to_vmem [thread:$0]  %s17_s19, 128, %s19_s23, [#allocation3]  }
   0x8   :  { %s315_s1 = smov [#allocation7]  }
   0x9   :  { %s42_s27 = sshll.u32 %s315_s1, 4  ;;  %s43_s27 = int_to_ptr.vmem [resolvable:$true] %s42_s27 }
   0xa   :  { %45 = dma.hbm_to_vmem [thread:$0]  %s41_s26, 128, %s43_s27, [#allocation6]  }
   0xb   :  { %305 = dma.done.wait [#allocation3], 128  }
   0xc   :  { %306 = vsyncadd [#allocation3], 4294967168 }
   0xd   :  { %307 = dma.done.wait [#allocation6], 6272  }
   0xe   :  { %308 = vsyncadd [#allocation6], 4294961024  ;;  %v74_v0 = vld [vmem:[#allocation5 + $0x78] sm:$0xff]  ;;  %v73_v1 = vld [vmem:[#allocation5 + $0x70] sm:$0xff]  ;;  %s316_s0 = smov [#allocation8]   ;;  %s185_s30 = sshll.u32 %s352_s3, 4  ;;  %s186_s30 = int_to_ptr.hbm [resolvable:$true] %s185_s30 }
   0xf   :  { %77 = vmatpush.msra.mxu0 %v74_v0  ;;  %v72_v2 = vld [vmem:[#allocation5 + $0x68] sm:$0xff]  ;;  %v71_v3 = vld [vmem:[#allocation5 + $0x60] sm:$0xff]  ;;  %v114_v4 = vld [vmem:[#allocation5 + $0xf8] sm:$0xff]  ;;  %s183_s2 = sshll.u32 %s316_s0, 4  ;;  %s184_s2 = int_to_ptr.vmem [resolvable:$true] %s183_s2 }
  0x10   :  { %v70_v5 = vld [vmem:[#allocation5 + $0x58] sm:$0xff]  ;;  %117 = vmatpush.msra.mxu1 %v114_v4  ;;  %v113_v6 = vld [vmem:[#allocation5 + $0xf0] sm:$0xff]  ;;  %v112_v7 = vld [vmem:[#allocation5 + $0xe8] sm:$0xff] }
  0x11   :  { %78 = vmatpush.msra.mxu0 %v73_v1  ;;  %v69_v8 = vld [vmem:[#allocation5 + $0x50] sm:$0xff]  ;;  %v111_v9 = vld [vmem:[#allocation5 + $0xe0] sm:$0xff]  ;;  %v68_v10 = vld [vmem:[#allocation5 + $0x48] sm:$0xff] }
  0x12   :  { %118 = vmatpush.msra.mxu1 %v113_v6  ;;  %v110_v11 = vld [vmem:[#allocation5 + $0xd8] sm:$0xff]  ;;  %v67_v12 = vld [vmem:[#allocation5 + $0x40] sm:$0xff]  ;;  %v109_v13 = vld [vmem:[#allocation5 + $0xd0] sm:$0xff] }
  0x13   :  { %79 = vmatpush.msra.mxu0 %v72_v2  ;;  %v66_v14 = vld [vmem:[#allocation5 + $0x38] sm:$0xff]  ;;  %v108_v15 = vld [vmem:[#allocation5 + $0xc8] sm:$0xff]  ;;  %v65_v16 = vld [vmem:[#allocation5 + $0x30] sm:$0xff] }
  0x14   :  { %119 = vmatpush.msra.mxu1 %v112_v7  ;;  %v107_v17 = vld [vmem:[#allocation5 + $0xc0] sm:$0xff]  ;;  %v64_v18 = vld [vmem:[#allocation5 + $0x28] sm:$0xff]  ;;  %v106_v19 = vld [vmem:[#allocation5 + $0xb8] sm:$0xff] }
  0x15   :  { %80 = vmatpush.msra.mxu0 %v71_v3  ;;  %v63_v20 = vld [vmem:[#allocation5 + $0x20] sm:$0xff]  ;;  %v105_v21 = vld [vmem:[#allocation5 + $0xb0] sm:$0xff]  ;;  %v62_v22 = vld [vmem:[#allocation5 + $0x18] sm:$0xff] }
  0x16   :  { %120 = vmatpush.msra.mxu1 %v111_v9  ;;  %v104_v23 = vld [vmem:[#allocation5 + $0xa8] sm:$0xff]  ;;  %v61_v24 = vld [vmem:[#allocation5 + $0x10] sm:$0xff]  ;;  %v59_v26 = vld [vmem:[#allocation5] sm:$0xff] }
  0x17   :  { %81 = vmatpush.msra.mxu0 %v70_v5  ;;  %v60_v25 = vld [vmem:[#allocation5 + $0x8] sm:$0xff]  ;;  %v58_v27 = vld [vmem:[#allocation2] sm:$0xff]  ;;  %v103_v28 = vld [vmem:[#allocation5 + $0xa0] sm:$0xff] }
  0x18   :  { %121 = vmatpush.msra.mxu1 %v110_v11  ;;  %v102_v29 = vld [vmem:[#allocation5 + $0x98] sm:$0xff]  ;;  %v101_v30 = vld [vmem:[#allocation5 + $0x90] sm:$0xff]  ;;  %v100_v31 = vld [vmem:[#allocation5 + $0x88] sm:$0xff] }
  0x19   :  { %82 = vmatpush.msra.mxu0 %v69_v8  ;;  %v99_v32 = vld [vmem:[#allocation5 + $0x80] sm:$0xff]  ;;  %v154_v33 = vld [vmem:[#allocation5 + $0x178] sm:$0xff]  ;;  %v153_v34 = vld [vmem:[#allocation5 + $0x170] sm:$0xff] }
  0x1a   :  { %122 = vmatpush.msra.mxu1 %v109_v13  ;;  %157 = vmatpush.msra.mxu2 %v154_v33  ;;  %v152_v35 = vld [vmem:[#allocation5 + $0x168] sm:$0xff]  ;;  %v151_v36 = vld [vmem:[#allocation5 + $0x160] sm:$0xff]  ;;  %v150_v37 = vld [vmem:[#allocation5 + $0x158] sm:$0xff] }
  0x1b   :  { %83 = vmatpush.msra.mxu0 %v68_v10  ;;  %v149_v38 = vld [vmem:[#allocation5 + $0x150] sm:$0xff]  ;;  %v148_v39 = vld [vmem:[#allocation5 + $0x148] sm:$0xff]  ;;  %v147_v40 = vld [vmem:[#allocation5 + $0x140] sm:$0xff] }
  0x1c   :  { %123 = vmatpush.msra.mxu1 %v108_v15  ;;  %158 = vmatpush.msra.mxu2 %v153_v34  ;;  %v146_v41 = vld [vmem:[#allocation5 + $0x138] sm:$0xff]  ;;  %v145_v42 = vld [vmem:[#allocation5 + $0x130] sm:$0xff]  ;;  %v144_v43 = vld [vmem:[#allocation5 + $0x128] sm:$0xff] }
  0x1d   :  { %84 = vmatpush.msra.mxu0 %v67_v12  ;;  %v202_v44 = vld [vmem:[#allocation7] ss:$0 sm:$0xff]  ;;  %v142_v49 = vld [vmem:[#allocation5 + $0x118] sm:$0xff]  ;;  %v141_v50 = vld [vmem:[#allocation5 + $0x110] sm:$0xff] }
  0x1e   :  { %124 = vmatpush.msra.mxu1 %v107_v17  ;;  %159 = vmatpush.msra.mxu2 %v152_v35  ;;  %v143_v48 = vld [vmem:[#allocation5 + $0x120] sm:$0xff]  ;;  %v140_v51 = vld [vmem:[#allocation5 + $0x108] sm:$0xff] }
  0x1f   :  { %85 = vmatpush.msra.mxu0 %v66_v14  ;;  %v139_v52 = vld [vmem:[#allocation5 + $0x100] sm:$0xff] }
  0x20   :  { %125 = vmatpush.msra.mxu1 %v106_v19  ;;  %160 = vmatpush.msra.mxu2 %v151_v36  ;;  %v203_v53 = vld [vmem:[#allocation7 + $0x1] ss:$0 sm:$0xff]  ;;  %v204_v57 = vld [vmem:[#allocation7 + $0x2] ss:$0 sm:$0xff] }
  0x21   :  { %86 = vmatpush.msra.mxu0 %v65_v16 }
  0x22   :  { %126 = vmatpush.msra.mxu1 %v105_v21  ;;  %161 = vmatpush.msra.mxu2 %v150_v37 }
  0x23   :  { %87 = vmatpush.msra.mxu0 %v64_v18 }
  0x24   :  { %127 = vmatpush.msra.mxu1 %v104_v23  ;;  %162 = vmatpush.msra.mxu2 %v149_v38 }
  0x25   :  { %88 = vmatpush.msra.mxu0 %v63_v20 }
  0x26   :  { %128 = vmatpush.msra.mxu1 %v103_v28  ;;  %163 = vmatpush.msra.mxu2 %v148_v39 }
  0x27   :  { %89 = vmatpush.msra.mxu0 %v62_v22 }
  0x28   :  { %129 = vmatpush.msra.mxu1 %v102_v29  ;;  %164 = vmatpush.msra.mxu2 %v147_v40 }
  0x29   :  { %90 = vmatpush.msra.mxu0 %v61_v24 }
  0x2a   :  { %130 = vmatpush.msra.mxu1 %v101_v30  ;;  %165 = vmatpush.msra.mxu2 %v146_v41 }
  0x2b   :  { %91 = vmatpush.msra.mxu0 %v60_v25 }
  0x2c   :  { %131 = vmatpush.msra.mxu1 %v100_v31  ;;  %166 = vmatpush.msra.mxu2 %v145_v42 }
  0x2d   :  { %92 = vmatpush.msra.mxu0 %v59_v26 }
  0x2e   :  { %93 = vmatmul.f32.vlgmr.msra.gmra.mxu0 %v58_v27  ;;  %132 = vmatpush.msra.mxu1 %v99_v32 }
  0x2f   :  { %167 = vmatpush.msra.mxu2 %v144_v43 }
  0x31   :  { %168 = vmatpush.msra.mxu2 %v143_v48 }
  0x33   :  { %169 = vmatpush.msra.mxu2 %v142_v49 }
  0x35   :  { %170 = vmatpush.msra.mxu2 %v141_v50 }
  0x37   :  { %171 = vmatpush.msra.mxu2 %v140_v51 }
  0x39   :  { %172 = vmatpush.msra.mxu2 %v139_v52 }
  0xab   :  { %v94_v45 = vpop.f32.mrf.mxu0 }
  0xac   :  { %v95_v46 = vadd.f32 %v202_v44, %v94_v45 }
  0xae   :  { %205 = vtanh.f32 %v95_v46 }
  0xb4   :  { %v206_v47 = vpop.eup %205 }
  0xb5   :  { %133 = vmatmul.f32.vlgmr.msra.gmra.mxu1 %v206_v47 }
 0x132   :  { %v134_v54 = vpop.f32.mrf.mxu1 }
 0x133   :  { %v135_v55 = vadd.f32 %v203_v53, %v134_v54 }
 0x135   :  { %207 = vtanh.f32 %v135_v55 }
 0x13b   :  { %v208_v56 = vpop.eup %207 }
 0x13c   :  { %173 = vmatmul.f32.vlgmr.msra.gmra.mxu2 %v208_v56 }
 0x1bf   :  { %v174_v58 = vpop.f32.mrf.mxu2 }
 0x1c0   :  { %v175_v59 = vadd.f32 %v204_v57, %v174_v58 }
 0x1c2   :  { %177 = vst [vmem:[#allocation8] sm:$0xff] %v175_v59 }
 0x1c3   :  { %188 = dma.vmem_to_hbm [thread:$0]  %s184_s2, 128, %s186_s30, [#allocation4]  }
 0x1c4   :  { %309 = dma.done.wait [#allocation4], 128  }
 0x1c5   :  { %310 = vsyncadd [#allocation4], 4294967168 }
 0x1c6   :  { %193 = vsyncpa [#allocation3], 1 }
 0x1c7   :  { %194 = vsyncpa [#allocation6], 1 }
 0x1c8   :  { %195 = vsyncpa [#allocation4], 1 }

</bundles_post_ra>
